<compile_context>
chip_gen: v7x
topology: tpu7x:2x2x1
jax: 0.10.0
libtpu: 0.0.40
codegen_flags: <defaults>
</compile_context>

<pallas_src>
import functools
import numpy as np
import jax
import jax.numpy as jnp
from jax import lax
from jax.experimental import pallas as pl
from jax.experimental.pallas import tpu as pltpu

KD = KH = KW = 3
NEG_SLOPE = 0.01  # nn.LeakyReLU() default
LANES = 128


def _cnn3d_kernel(a_ref, w_ref, b_ref, o_ref, *, n_pool_pad):
    # a_ref: (8 * n_pool_pad, K_pad) bf16 -- im2col patches for ONE batch element,
    #        laid out as 8 sublane-aligned pool-offset slabs.
    # w_ref: (K_pad, Cout_pad) bf16 conv weights (resident across the batch grid).
    # b_ref: (1, Cout_pad) f32 bias.
    # o_ref: (n_pool_pad, Cout_pad) pooled output block (lane-dense).
    conv = jnp.dot(a_ref[...], w_ref[...], preferred_element_type=jnp.float32)
    conv = conv + b_ref[...]
    act = jnp.where(conv >= 0, conv, NEG_SLOPE * conv)            # LeakyReLU (VPU)
    p = n_pool_pad
    # MaxPool3d(2, 2): depth-3 tree reduction over the 8 aligned offset slabs.
    m01 = jnp.maximum(act[0 * p:1 * p, :], act[1 * p:2 * p, :])
    m23 = jnp.maximum(act[2 * p:3 * p, :], act[3 * p:4 * p, :])
    m45 = jnp.maximum(act[4 * p:5 * p, :], act[5 * p:6 * p, :])
    m67 = jnp.maximum(act[6 * p:7 * p, :], act[7 * p:8 * p, :])
    pooled = jnp.maximum(jnp.maximum(m01, m23), jnp.maximum(m45, m67))
    o_ref[...] = pooled.astype(o_ref.dtype)


def simple_cnn3d_forward(x, weight, bias):
    N, Cin, D, H, W = x.shape
    Cout = weight.shape[0]
    Do, Ho, Wo = D - KD + 1, H - KH + 1, W - KW + 1          # conv (padding=0)
    Pd, Ph, Pw = Do // 2, Ho // 2, Wo // 2                   # pool (k=2, s=2)
    n_windows = Pd * Ph * Pw
    n_pool_pad = ((n_windows + 7) // 8) * 8                  # sublane-align pool slabs
    K = Cin * KD * KH * KW
    K_pad = ((K + LANES - 1) // LANES) * LANES               # lane-align contraction
    Cout_pad = ((Cout + LANES - 1) // LANES) * LANES         # lane-dense output
    M_blk = 8 * n_pool_pad                                   # rows per batch element

    # --- glue: im2col via slices + reshape/transpose/pad only (no gather) ---
    # Cast to bf16 BEFORE the 27x expansion so glue HBM traffic is halved.
    xb = x.astype(jnp.bfloat16)
    shifted = jnp.stack(
        [xb[:, :, kd:kd + Do, kh:kh + Ho, kw:kw + Wo]
         for kd in range(KD) for kh in range(KH) for kw in range(KW)],
        axis=-1)                                             # (N, Cin, Do, Ho, Wo, 27)
    patches = shifted.transpose(0, 2, 3, 4, 1, 5).reshape(N, Do, Ho, Wo, K)
    patches = patches[:, :2 * Pd, :2 * Ph, :2 * Pw, :]       # pool floor (drop remainder)
    # Re-tile so the 8 pool-window offsets become 8 contiguous row slabs per batch.
    a = patches.reshape(N, Pd, 2, Ph, 2, Pw, 2, K)
    a = a.transpose(0, 2, 4, 6, 1, 3, 5, 7)                  # (N, 2,2,2, Pd,Ph,Pw, K)
    a = a.reshape(N, 8, n_windows, K)
    a = jnp.pad(a, ((0, 0), (0, 0), (0, n_pool_pad - n_windows), (0, K_pad - K)))
    a = a.reshape(N * M_blk, K_pad)                          # already bf16

    w_mat = weight.reshape(Cout, K).T.astype(jnp.bfloat16)   # (K, Cout)
    w_mat = jnp.pad(w_mat, ((0, K_pad - K), (0, Cout_pad - Cout)))
    b_mat = jnp.pad(bias.reshape(1, Cout).astype(jnp.float32),
                    ((0, 0), (0, Cout_pad - Cout)))

    kernel = functools.partial(_cnn3d_kernel, n_pool_pad=n_pool_pad)

    a_blk_bytes = M_blk * K_pad * 2
    o_blk_bytes = n_pool_pad * Cout_pad * 4
    vmem_bytes = min(
        64 * 1024 * 1024,
        4 * (a_blk_bytes + o_blk_bytes) + w_mat.size * 2 + b_mat.size * 4
        + (4 << 20))

    cost = pl.CostEstimate(
        flops=2 * (N * M_blk) * K_pad * Cout_pad,
        transcendentals=0,
        bytes_accessed=(a.size * 2 + w_mat.size * 2 + b_mat.size * 4
                        + N * n_pool_pad * Cout_pad * 4))

    pooled = pl.pallas_call(
        kernel,
        out_shape=jax.ShapeDtypeStruct((N * n_pool_pad, Cout_pad), jnp.float32),
        grid=(N,),
        in_specs=[
            pl.BlockSpec((M_blk, K_pad), lambda n: (n, 0)),        # per-batch A block
            pl.BlockSpec((K_pad, Cout_pad), lambda n: (0, 0)),     # resident weights
            pl.BlockSpec((1, Cout_pad), lambda n: (0, 0)),         # resident bias
        ],
        out_specs=pl.BlockSpec((n_pool_pad, Cout_pad), lambda n: (n, 0)),
        compiler_params=pltpu.CompilerParams(
            dimension_semantics=("parallel",),
            vmem_limit_bytes=vmem_bytes),
        cost_estimate=cost,
    )(a, w_mat, b_mat)

    # (N*n_pool_pad, Cout_pad) -> NCDHW (N, Cout, Pd, Ph, Pw)
    pooled = pooled.reshape(N, n_pool_pad, Cout_pad)[:, :n_windows, :Cout]
    return pooled.reshape(N, Pd, Ph, Pw, Cout).transpose(0, 4, 1, 2, 3).astype(x.dtype)


if __name__ == "__main__":
    key = jax.random.PRNGKey(0)
    kx, kw, kb = jax.random.split(key, 3)

    N, Cin, Cout, S = 2, 4, 8, 8
    x = jax.random.normal(kx, (N, Cin, S, S, S), dtype=jnp.float32)

    # Deterministic Conv3d-style init (uniform in +/- 1/sqrt(fan_in)).
    fan_in = Cin * KD * KH * KW
    bound = 1.0 / np.sqrt(fan_in)
    weight = jax.random.uniform(kw, (Cout, Cin, KD, KH, KW), jnp.float32, -bound, bound)
    bias = jax.random.uniform(kb, (Cout,), jnp.float32, -bound, bound)

    out = jax.block_until_ready(simple_cnn3d_forward(x, weight, bias))

    # Pure-JAX reference for verification.
    conv = lax.conv_general_dilated(
        x, weight, (1, 1, 1), "VALID",
        dimension_numbers=("NCDHW", "OIDHW", "NCDHW"),
        precision=lax.Precision.HIGHEST) + bias.reshape(1, Cout, 1, 1, 1)
    act = jnp.where(conv >= 0, conv, NEG_SLOPE * conv)
    ref = lax.reduce_window(act, -jnp.inf, lax.max,
                            (1, 1, 2, 2, 2), (1, 1, 2, 2, 2), "VALID")

    assert out.shape == ref.shape == (N, Cout, 3, 3, 3), (out.shape, ref.shape)
    np.testing.assert_allclose(np.asarray(out), np.asarray(ref), atol=2e-2, rtol=2e-2)
    print("KERNEL_OK")
</pallas_src>

<mosaic_0001>
module attributes {stable_mosaic.version = 11 : i64} {
  func.func @_cnn3d_kernel(%arg0: i32, %arg1: memref<256x128xbf16, #tpu.memory_space<vmem>>, %arg2: memref<128x128xbf16, #tpu.memory_space<vmem>>, %arg3: memref<1x128xf32, #tpu.memory_space<vmem>>, %arg4: memref<32x128xf32, #tpu.memory_space<vmem>>) attributes {dimension_semantics = [#tpu.dimension_semantics<parallel>], iteration_bounds = array<i64: 2>, scalar_prefetch = 0 : i64, scratch_operands = 0 : i64, tpu.core_type = #tpu.core_type<tc>, window_params = [{transform_indices = @transform_0, window_bounds = array<i64: 256, 128>}, {pipeline_mode = #tpu.pipeline_mode<synchronous>, transform_indices = @transform_1, window_bounds = array<i64: 128, 128>}, {pipeline_mode = #tpu.pipeline_mode<synchronous>, transform_indices = @transform_2, window_bounds = array<i64: 1, 128>}, {transform_indices = @transform_3, window_bounds = array<i64: 32, 128>}]} {
    %c0 = arith.constant 0 : index
    %c0_0 = arith.constant 0 : index
    %0 = vector.load %arg1[%c0, %c0_0] : memref<256x128xbf16, #tpu.memory_space<vmem>>, vector<256x128xbf16>
    %c0_1 = arith.constant 0 : index
    %c0_2 = arith.constant 0 : index
    %1 = vector.load %arg2[%c0_1, %c0_2] : memref<128x128xbf16, #tpu.memory_space<vmem>>, vector<128x128xbf16>
    %cst = arith.constant dense<0.000000e+00> : vector<256x128xf32>
    %2 = tpu.matmul %0, %1, %cst {dimension_numbers = #tpu.dot_dimension_numbers<[1], [0], [0], [1], [0, 0, 1, 1], [], []>} : vector<256x128xbf16>, vector<128x128xbf16>, vector<256x128xf32> -> vector<256x128xf32>
    %c0_3 = arith.constant 0 : index
    %c0_4 = arith.constant 0 : index
    %3 = vector.load %arg3[%c0_3, %c0_4] : memref<1x128xf32, #tpu.memory_space<vmem>>, vector<1x128xf32>
    %4 = vector.broadcast %3 : vector<1x128xf32> to vector<256x128xf32>
    %5 = arith.addf %2, %4 : vector<256x128xf32>
    %cst_5 = arith.constant 0.000000e+00 : f32
    %6 = vector.broadcast %cst_5 : f32 to vector<256x128xf32>
    %7 = arith.cmpf oge, %5, %6 : vector<256x128xf32>
    %cst_6 = arith.constant 0.00999999977 : f32
    %8 = vector.broadcast %cst_6 : f32 to vector<256x128xf32>
    %9 = arith.mulf %8, %5 : vector<256x128xf32>
    %10 = arith.select %7, %5, %9 : vector<256x128xi1>, vector<256x128xf32>
    %11 = vector.extract_strided_slice %10 {offsets = [0, 0], sizes = [32, 128], strides = [1, 1]} : vector<256x128xf32> to vector<32x128xf32>
    %12 = vector.extract_strided_slice %10 {offsets = [32, 0], sizes = [32, 128], strides = [1, 1]} : vector<256x128xf32> to vector<32x128xf32>
    %13 = arith.maximumf %11, %12 : vector<32x128xf32>
    %14 = vector.extract_strided_slice %10 {offsets = [64, 0], sizes = [32, 128], strides = [1, 1]} : vector<256x128xf32> to vector<32x128xf32>
    %15 = vector.extract_strided_slice %10 {offsets = [96, 0], sizes = [32, 128], strides = [1, 1]} : vector<256x128xf32> to vector<32x128xf32>
    %16 = arith.maximumf %14, %15 : vector<32x128xf32>
    %17 = vector.extract_strided_slice %10 {offsets = [128, 0], sizes = [32, 128], strides = [1, 1]} : vector<256x128xf32> to vector<32x128xf32>
    %18 = vector.extract_strided_slice %10 {offsets = [160, 0], sizes = [32, 128], strides = [1, 1]} : vector<256x128xf32> to vector<32x128xf32>
    %19 = arith.maximumf %17, %18 : vector<32x128xf32>
    %20 = vector.extract_strided_slice %10 {offsets = [192, 0], sizes = [32, 128], strides = [1, 1]} : vector<256x128xf32> to vector<32x128xf32>
    %21 = vector.extract_strided_slice %10 {offsets = [224, 0], sizes = [32, 128], strides = [1, 1]} : vector<256x128xf32> to vector<32x128xf32>
    %22 = arith.maximumf %20, %21 : vector<32x128xf32>
    %23 = arith.maximumf %13, %16 : vector<32x128xf32>
    %24 = arith.maximumf %19, %22 : vector<32x128xf32>
    %25 = arith.maximumf %23, %24 : vector<32x128xf32>
    %c0_7 = arith.constant 0 : index
    %c0_8 = arith.constant 0 : index
    %26 = vector.load %arg4[%c0_7, %c0_8] : memref<32x128xf32, #tpu.memory_space<vmem>>, vector<32x128xf32>
    tpu.vector_store %arg4[%c0_7, %c0_8], %25 {strides = array<i32>} : memref<32x128xf32, #tpu.memory_space<vmem>>, vector<32x128xf32>,
    return
  }
  func.func @transform_0(%arg0: i32) -> (i32, i32) {
    %c0_i32 = arith.constant 0 : i32
    %c0_i32_0 = arith.constant 0 : i32
    return %arg0, %c0_i32 : i32, i32
  }
  func.func @transform_1(%arg0: i32) -> (i32, i32) {
    %c0_i32 = arith.constant 0 : i32
    %c0_i32_0 = arith.constant 0 : i32
    %c0_i32_1 = arith.constant 0 : i32
    return %c0_i32, %c0_i32_0 : i32, i32
  }
  func.func @transform_2(%arg0: i32) -> (i32, i32) {
    %c0_i32 = arith.constant 0 : i32
    %c0_i32_0 = arith.constant 0 : i32
    %c0_i32_1 = arith.constant 0 : i32
    return %c0_i32, %c0_i32_0 : i32, i32
  }
  func.func @transform_3(%arg0: i32) -> (i32, i32) {
    %c0_i32 = arith.constant 0 : i32
    %c0_i32_0 = arith.constant 0 : i32
    return %arg0, %c0_i32 : i32, i32
  }
}

</mosaic_0001>

<bundles_post_ra>
// kernel: tpu_custom_call.1
= control target key start
LH: loop header
LB: loop body
LE: loop exit
PB: predicated region body
PF: predicated region fallthrough
CT: control target
= control target key end

     0   :  { %8 = vsyncpa [#allocation3], 0  ;;  %s1532_s0 = inlined_call_operand.hbm [shape: bf16[512,128], index: 0, kind: input, shape index: {}]   ;;  %s1533_s1 = inlined_call_operand.hbm [shape: bf16[128,128], index: 1, kind: input, shape index: {}]   ;;  %s1534_s2 = inlined_call_operand.vmem [shape: f32[1,128], index: 2, kind: input, shape index: {}]   ;;  %s1535_s3 = inlined_call_operand.hbm [shape: f32[64,128], index: 3, kind: output, shape index: {}]  }
   0x1   :  { %10 = vsyncpa [#allocation3 + $0x1], 0 }
   0x2   :  { %11 = vsyncpa [#allocation6], 0 }
   0x3   :  { %12 = vsyncpa [#allocation4], 0 }
   0x4   :  { %14 = vsyncpa [#allocation4 + $0x1], 0  ;;  %s1165_s12 = smov 0   ;;  %s1167_s13 = smov 0  }
   0x5   :  { %s1169_s14 = smov 0   ;;  %s1171_s15 = smov 0  }
   0x6 LB: > { %s1186_s16 = sadd.s32 4294967295, %s1136_s15   ;;  %s792_s17 = sadd.s32 4294967294, %s1136_s15   ;;  %s1136_s15 = sphi %s1171_s15, %s1555_s15   ;;  %s1132_s14 = sphi %s1169_s14, %s1554_s14   ;;  %s1128_s13 = sphi %s1167_s13, %s1553_s13   ;;  %s1124_s12 = sphi %s1165_s12, %s1552_s12  }
   0x7   : > { %p40_p0 = scmp.ne.s32.totalorder %s1128_s13, %s1124_s12  ;;  %p1536_p1 = scmp.eq.s32.totalorder %s1186_s16, 0 }
   0x8   : > { %p112_p3 = scmp.eq.s32.totalorder %s792_s17, 1  ;;  %p793_p5 = scmp.ge.s32.totalorder %s1136_s15, 1 }
   0x9   : > { %p1195_p4 = por %p1536_p1, %p40_p0  ;;  %p119_p7 = scmp.lt.s32.totalorder %s1136_s15, 3 }
   0xa   : > { %p1200_p6 = por %p112_p3, %p40_p0  ;;  %s1138_s21 = smov [#allocation5]  }
   0xb   : > { %s1539_s18 = scalar_select %p1195_p4, 1, 0 }
   0xc   : > { %s1540_s19 = scalar_select %p1200_p6, 1, 0 }
   0xd   : > { %p1205_p8 = pnand %p793_p5, %p119_p7  ;;  %s131_s22 = sshll.u32 %s1138_s21, 4  ;;  %s1209_s22 = int_to_ptr.vmem [resolvable:$true] %s131_s22 }
   0xe   : > { %s1221_s24 = sadd.s32 1, %s1136_s15   ;;  %s27_s25 = sadd.s32 1, %s1132_s14 }
   0xf   : > { %s1541_s20 = scalar_select %p1205_p8, 1, 0 }
  0x10   : > { %p931_p9 = pneg %p1205_p8  ;;  %s24_s26 = ssub.s32 %s1136_s15, %s1221_s24 }
  0x11   : > { %s1008_s29 = scalar_lea.hbm %s1533_s1, 1024 }
  0x12   : > { %p1216_p11 = pnand %p931_p9, %p1536_p1  ;;  %p1009_p12 = scmp.ne.s32.totalorder %s1533_s1, %s1008_s29 }
  0x13   : > { %p1015_p5 = scmp.lt.u32.totalorder %s1008_s29, %s1533_s1 }
  0x14   : > { %p1010_p13 = pneg %p1216_p11 }
  0x16   : > { %p1011_p0 = pnand %p1010_p13, %p1009_p12 }
  0x18   : > { %p1012_p3 = pneg %p1011_p0 }
  0x1a   : > { %p1017_p7 = pnand %p1015_p5, %p1012_p3 }
  0x1c   : > { %1020 = shalt.err (!%p1017_p7)
}
  0x1d   : > { %s1021_s7 = scalar_lea.vmem %s1209_s22, 1024  ;;  %p1029_p2 = scmp.lt.s32.totalorder %s1209_s22, %s1209_s22 }
  0x1e   : > { %p1022_p9 = scmp.ne.s32.totalorder %s1209_s22, %s1021_s7  ;;  %p1030_p6 = scmp.lt.s32.totalorder %s1021_s7, %s1021_s7 }
  0x20   : > { %p1024_p10 = pnand %p1022_p9, %p1010_p13  ;;  %p1031_p4 = por %p1030_p6, %p1029_p2 }
  0x22   : > { %p1025_p1 = pneg %p1024_p10 }
  0x24   : > { %p1032_p8 = pnand %p1031_p4, %p1025_p1 }
  0x26   : > { %1035 = shalt.err (!%p1032_p8)
}
  0x27   : > { %s1139_s8 = smov 64   ;;  %s1140_s9 = smov 4  }
  0x28   : > { %934 = dma.hbm_to_vmem [thread:$0]  (!%p1216_p11), %s1533_s1, 1024, %s1209_s22, [#allocation6], %s1139_s8, %s1139_s8, %s1140_s9  }
  0x29   : > { %p25_p1 = scmp.eq.s32.totalorder %s24_s26, 0  ;;  %p34_p2 = scmp.ne.s32.totalorder %s1132_s14, %s1128_s13 }
  0x2a   : > { %p35_p4 = scmp.eq.s32.totalorder %s1136_s15, 0  ;;  %p944_p6 = scmp.lt.s32.totalorder %s1136_s15, 2 }
  0x2b   : > { %s1255_s17 = scalar_select %p25_p1, %s1132_s14, %s27_s25  }
  0x2c   : > { %p36_p8 = por %p35_p4, %p34_p2  ;;  %p1543_p10 = scmp.eq.s32.totalorder %s1186_s16, 1 }
  0x2d   : > { %s148_s23 = sand.u32 1, %s1132_s14   ;;  %s833_s27 = sshll.u32 %s1136_s15, 11 }
  0x2e   : > { %p1259_p12 = por %p1543_p10, %p34_p2  ;;  %s796_s28 = sshll.u32 %s148_s23, 7 }
  0x2f   : > { %s1268_s4 = scalar_lea.hbm %s1532_s0, %s833_s27  ;;  %s152_s22 = scalar_lea.vmem [#allocation2], %s796_s28 }
  0x30   : > { %s159_s25 = sshll.u32 %s152_s22, 4  ;;  %p1270_p11 = pnand %p944_p6, %p36_p8  ;;  %s1274_s25 = int_to_ptr.vmem [resolvable:$true] %s159_s25 }
  0x31   : > { %s1276_s5 = scalar_lea.sflag [#allocation3], %s148_s23  ;;  %s1036_s6 = scalar_lea.hbm %s1268_s4, 2048 }
  0x32   : > { %p1037_p13 = scmp.ne.s32.totalorder %s1268_s4, %s1036_s6  ;;  %p1038_p0 = pneg %p1270_p11 }
  0x33   : > { %s1041_s11 = scalar_lea.hbm %s1532_s0, 4096  ;;  %p1042_p7 = scmp.lt.u32.totalorder %s1268_s4, %s1532_s0 }
  0x34   : > { %p1039_p3 = pnand %p1038_p0, %p1037_p13  ;;  %p1043_p9 = scmp.lt.u32.totalorder %s1041_s11, %s1036_s6 }
  0x35   : > { %p1045_p2 = scmp.lt.u32.totalorder %s1036_s6, %s1268_s4 }
  0x36   : > { %p1040_p5 = pneg %p1039_p3  ;;  %p1044_p1 = por %p1043_p9, %p1042_p7 }
  0x38   : > { %p1046_p4 = por %p1045_p2, %p1044_p1 }
  0x3a   : > { %p1047_p6 = pnand %p1046_p4, %p1040_p5 }
  0x3c   : > { %1050 = shalt.err (!%p1047_p6)
}
  0x3d   : > { %s1051_s23 = scalar_lea.vmem %s1274_s25, 2048  ;;  %s1141_s29 = smov [#allocation2]  }
  0x3e   : > { %p1052_p8 = scmp.ne.s32.totalorder %s1274_s25, %s1051_s23  ;;  %s1056_s30 = sshll.u32 %s1141_s29, 4  ;;  %s1057_s30 = int_to_ptr.vmem [resolvable:$false] %s1056_s30 }
  0x3f   : > { %s1058_s22 = scalar_lea.vmem %s1057_s30, 4096  ;;  %p1059_p3 = scmp.lt.s32.totalorder %s1274_s25, %s1057_s30 }
  0x40   : > { %p1054_p10 = pnand %p1052_p8, %p1038_p0  ;;  %p1060_p7 = scmp.lt.s32.totalorder %s1058_s22, %s1051_s23 }
  0x42   : > { %p1055_p13 = pneg %p1054_p10  ;;  %p1061_p9 = por %p1060_p7, %p1059_p3 }
  0x44   : > { %p1062_p1 = pnand %p1061_p9, %p1055_p13 }
  0x46   : > { %1065 = shalt.err (!%p1062_p1)
}
  0x47   : > { %938 = dma.hbm_to_vmem [thread:$0]  (!%p1270_p11), %s1268_s4, 2048, %s1274_s25, %s1276_s5, %s1139_s8, %s1139_s8, %s1140_s9  }
  0x48   : > { %p1546_p0 = scmp.ne.s32.totalorder %s1541_s20, 0 }
  0x49   : > { %s1310_s6 = sand.u32 (!%p1546_p0), 1, %s1128_s13   ;;  %p1547_p5 = scmp.ne.s32.totalorder (!%p1546_p0), %s1539_s18, 0 }
  0x4a   : > { %171 = sbr.rel (%p1546_p0) target bundleno = 391 (0x187), region = 32  ;;  %s800_s7 = sshll.u32 (!%p1546_p0), %s1310_s6, 7 }
  0x4b   : > { %s174_s10 = scalar_lea.sflag (!%p1546_p0), [#allocation3], %s1310_s6  ;;  %s1314_s11 = scalar_lea.vmem (!%p1546_p0), [#allocation2], %s800_s7 }
  0x51   : > { %1111 = dma.done.wait (%p1547_p5), %s174_s10, 2048  }
  0x52   : > { %1113 = vsyncadd (%p1547_p5), %s174_s10, 4294965248  ;;  %p1548_p11 = scmp.eq.s32.totalorder %s1186_s16, 0 }
  0x54   : > { %1115 = dma.done.wait (%p1548_p11), [#allocation6], 1024   ;;  %p1549_p2 = pmov %p1548_p11 }
  0x55   : > { %v984_v0 = vld [vmem:[#allocation5] sm:$0xff]   ;;  %v985_v1 = vld [vmem:[#allocation5 + $0x8] sm:$0xff]   ;;  %v986_v2 = vld [vmem:[#allocation5 + $0x10] sm:$0xff]   ;;  %s802_s8 = sshll.u32 %s1310_s6, 5  ;;  %s834_s4 = sshll.u32 %s1186_s16, 9 }
  0x56   : > { %1117 = vsyncadd (%p1549_p2), [#allocation6], 4294966272  ;;  %859 = vmatprep.subr.bf16.mxu0 %v984_v0  ;;  %907 = vmatprep.subr.bf16.mxu1 %v984_v0  ;;  %v987_v3 = vld [vmem:[#allocation5 + $0x18] sm:$0xff]   ;;  %v992_v4 = vld [vmem:[%s1314_s11] sm:$0xff]   ;;  %s203_s9 = scalar_lea.vmem [#allocation7], %s802_s8  ;;  %s1486_s27 = scalar_lea.hbm %s1535_s3, %s834_s4 }
  0x57   : > { %860 = vmatpush3.bf16.msra.mxu0 %v984_v0  ;;  %915 = vmatpush3.bf16.msra.mxu1 %v984_v0  ;;  %v993_v5 = vld [vmem:[%s1314_s11 + $0x40] sm:$0xff]   ;;  %v989_v7 = vld [vmem:[#allocation5 + $0x28] sm:$0xff]   ;;  %v990_v8 = vld [vmem:[#allocation5 + $0x30] sm:$0xff]   ;;  %s709_s25 = sshll.u32 %s203_s9, 4  ;;  %s696_s16 = scalar_lea.sflag [#allocation4], %s1310_s6  ;;  %s1488_s25 = int_to_ptr.vmem [resolvable:$true] %s709_s25 }
  0x58   : > { %861 = vmatprep.subr.bf16.mxu0 %v985_v1  ;;  %908 = vmatprep.subr.bf16.mxu1 %v985_v1  ;;  %v988_v6 = vld [vmem:[#allocation5 + $0x20] sm:$0xff]   ;;  %v991_v9 = vld [vmem:[#allocation5 + $0x38] sm:$0xff]   ;;  %v994_v10 = vld [vmem:[%s1314_s11 + $0x8] sm:$0xff]   ;;  %s1066_s28 = scalar_lea.vmem %s1488_s25, 512  ;;  %s1142_s23 = smov [#allocation7]  }
  0x59   : > { %875 = vmatprep.mubr.bf16.mxu0 %v992_v4  ;;  %891 = vmatprep.mubr.bf16.mxu1 %v993_v5  ;;  %v995_v11 = vld [vmem:[%s1314_s11 + $0x48] sm:$0xff]   ;;  %v996_v12 = vld [vmem:[%s1314_s11 + $0x10] sm:$0xff]   ;;  %v998_v14 = vld [vmem:[%s1314_s11 + $0x18] sm:$0xff]   ;;  %p1067_p4 = scmp.ne.s32.totalorder %s1488_s25, %s1066_s28  ;;  %s1070_s29 = sshll.u32 %s1142_s23, 4  ;;  %s1071_s29 = int_to_ptr.vmem [resolvable:$false] %s1070_s29 }
  0x5a   : > { %v997_v13 = vld [vmem:[%s1314_s11 + $0x50] sm:$0xff]   ;;  %v999_v15 = vld [vmem:[%s1314_s11 + $0x58] sm:$0xff]   ;;  %v1000_v16 = vld [vmem:[%s1314_s11 + $0x20] sm:$0xff]   ;;  %s1072_s30 = scalar_lea.vmem %s1071_s29, 1024  ;;  %p1073_p10 = scmp.lt.s32.totalorder %s1488_s25, %s1071_s29 }
  0x5b   : > { %862 = vmatpush3.bf16.msra.mxu0 %v985_v1  ;;  %916 = vmatpush3.bf16.msra.mxu1 %v985_v1  ;;  %v1001_v17 = vld [vmem:[%s1314_s11 + $0x60] sm:$0xff]   ;;  %v1002_v18 = vld [vmem:[%s1314_s11 + $0x28] sm:$0xff]   ;;  %v1004_v20 = vld [vmem:[%s1314_s11 + $0x30] sm:$0xff]   ;;  %p1068_p6 = pnand %p1067_p4, %p1259_p12  ;;  %p1074_p13 = scmp.lt.s32.totalorder %s1072_s30, %s1066_s28 }
  0x5c   : > { %863 = vmatprep.subr.bf16.mxu0 %v986_v2  ;;  %909 = vmatprep.subr.bf16.mxu1 %v986_v2  ;;  %v1003_v19 = vld [vmem:[%s1314_s11 + $0x68] sm:$0xff]   ;;  %v1005_v21 = vld [vmem:[%s1314_s11 + $0x70] sm:$0xff]   ;;  %v1006_v22 = vld [vmem:[%s1314_s11 + $0x38] sm:$0xff]  }
  0x5d   : > { %v1007_v23 = vld [vmem:[%s1314_s11 + $0x78] sm:$0xff]   ;;  %v1343_v24 = vld [vmem:[%s1534_s2] ss:$0 sm:$0xff]  ;;  %p1069_p8 = pneg %p1068_p6  ;;  %p1075_p3 = por %p1074_p13, %p1073_p10 }
  0x5f   : > { %864 = vmatpush3.bf16.msra.mxu0 %v986_v2  ;;  %917 = vmatpush3.bf16.msra.mxu1 %v986_v2  ;;  %p1076_p7 = pnand %p1075_p3, %p1069_p8 }
  0x60   : > { %865 = vmatprep.subr.bf16.mxu0 %v987_v3  ;;  %910 = vmatprep.subr.bf16.mxu1 %v987_v3 }
  0x63   : > { %866 = vmatpush3.bf16.msra.mxu0 %v987_v3  ;;  %918 = vmatpush3.bf16.msra.mxu1 %v987_v3 }
  0x64   : > { %867 = vmatprep.subr.bf16.mxu0 %v988_v6  ;;  %911 = vmatprep.subr.bf16.mxu1 %v988_v6 }
  0x67   : > { %868 = vmatpush3.bf16.msra.mxu0 %v988_v6  ;;  %919 = vmatpush3.bf16.msra.mxu1 %v988_v6 }
  0x68   : > { %869 = vmatprep.subr.bf16.mxu0 %v989_v7  ;;  %912 = vmatprep.subr.bf16.mxu1 %v989_v7 }
  0x6b   : > { %870 = vmatpush3.bf16.msra.mxu0 %v989_v7  ;;  %920 = vmatpush3.bf16.msra.mxu1 %v989_v7 }
  0x6c   : > { %871 = vmatprep.subr.bf16.mxu0 %v990_v8  ;;  %913 = vmatprep.subr.bf16.mxu1 %v990_v8 }
  0x6f   : > { %872 = vmatpush3.bf16.msra.mxu0 %v990_v8  ;;  %921 = vmatpush3.bf16.msra.mxu1 %v990_v8 }
  0x70   : > { %873 = vmatprep.subr.bf16.mxu0 %v991_v9  ;;  %914 = vmatprep.subr.bf16.mxu1 %v991_v9 }
  0x73   : > { %874 = vmatpush3.bf16.msra.mxu0 %v991_v9  ;;  %922 = vmatpush3.bf16.msra.mxu1 %v991_v9 }
  0x76   : > { %876 = vmatmul.mubr.bf16.vlgmr.msra.gmra.mrb[0].mxu0 %v994_v10  ;;  %892 = vmatmul.mubr.bf16.vlgmr.msra.gmra.mrb[0].mxu1 %v995_v11 }
  0x77   : > { %879 = vmatprep.mubr.bf16.mxu0 %v996_v12  ;;  %895 = vmatprep.mubr.bf16.mxu1 %v997_v13 }
  0x7e   : > { %880 = vmatmul.mubr.bf16.gmra.mrb[4].mxu0 %v998_v14  ;;  %896 = vmatmul.mubr.bf16.gmra.mrb[4].mxu1 %v999_v15 }
  0x7f   : > { %883 = vmatprep.mubr.bf16.mxu0 %v1000_v16  ;;  %899 = vmatprep.mubr.bf16.mxu1 %v1001_v17 }
  0x86   : > { %884 = vmatmul.mubr.bf16.gmra.mrb[8].mxu0 %v1002_v18  ;;  %900 = vmatmul.mubr.bf16.gmra.mrb[8].mxu1 %v1003_v19 }
  0x87   : > { %887 = vmatprep.mubr.bf16.mxu0 %v1004_v20  ;;  %903 = vmatprep.mubr.bf16.mxu1 %v1005_v21 }
  0x8e   : > { %888 = vmatmul.mubr.bf16.gmra.mrb[12].mxu0 %v1006_v22  ;;  %904 = vmatmul.mubr.bf16.gmra.mrb[12].mxu1 %v1007_v23 }
 0x149   : > { %v877_v25 = vpop.f32.mrb[0].mxu0  ;;  %v893_v26 = vpop.f32.mrb[0].mxu1 }
 0x14a   : > { %v449_v27 = vadd.f32 %v877_v25, %v1343_v24  ;;  %v513_v28 = vadd.f32 %v893_v26, %v1343_v24  ;;  %v440_v29 = vpop.f32.mrb[1].mxu0  ;;  %v504_v30 = vpop.f32.mrb[1].mxu1 }
 0x14b   : > { %v441_v31 = vadd.f32 %v1343_v24, %v440_v29  ;;  %v505_v32 = vadd.f32 %v1343_v24, %v504_v30  ;;  %v878_v33 = vpop.f32.mrb[2].mxu0  ;;  %v894_v34 = vpop.f32.mrb[2].mxu1 }
 0x14c   : > { %vm569_vm0 = vcmp.ge.f32.partialorder %v449_v27, 0.0  ;;  %v601_v35 = vmul.f32 0.01, %v449_v27  ;;  %vm585_vm1 = vcmp.ge.f32.partialorder %v513_v28, 0.0  ;;  %v617_v36 = vmul.f32 0.01, %v513_v28 }
 0x14d   : > { %v599_v37 = vmul.f32 0.01, %v441_v31  ;;  %v615_v38 = vmul.f32 0.01, %v505_v32  ;;  %v452_v39 = vadd.f32 %v878_v33, %v1343_v24  ;;  %v516_v40 = vadd.f32 %v894_v34, %v1343_v24  ;;  %v443_v41 = vpop.f32.mrb[3].mxu0  ;;  %v507_v42 = vpop.f32.mrb[3].mxu1 }
 0x14e   : > { %vm567_vm2 = vcmp.ge.f32.partialorder %v441_v31, 0.0  ;;  %vm583_vm3 = vcmp.ge.f32.partialorder %v505_v32, 0.0  ;;  %v1352_v43 = vadd.f32 %v1343_v24, %v443_v41  ;;  %v1355_v44 = vadd.f32 %v1343_v24, %v507_v42 }
 0x14f   : > { %v602_v45 = vmul.f32 0.01, %v452_v39  ;;  %v1357_v46 = vsel %vm569_vm0, %v449_v27, %v601_v35  ;;  %v1359_v47 = vsel %vm585_vm1, %v513_v28, %v617_v36  ;;  %vm570_vm4 = vcmp.ge.f32.partialorder %v452_v39, 0.0 }
 0x150   : > { %v1361_v48 = vsel %vm567_vm2, %v441_v31, %v599_v37  ;;  %v1363_v49 = vsel %vm583_vm3, %v505_v32, %v615_v38  ;;  %vm586_vm5 = vcmp.ge.f32.partialorder %v516_v40, 0.0  ;;  %v618_v50 = vmul.f32 0.01, %v516_v40 }
 0x151   : > { %v881_v51 = vpop.f32.mrb[4].mxu0  ;;  %v897_v52 = vpop.f32.mrb[4].mxu1  ;;  %vm568_vm6 = vcmp.ge.f32.partialorder %v1352_v43, 0.0  ;;  %v600_v53 = vmul.f32 0.01, %v1352_v43  ;;  %vm584_vm7 = vcmp.ge.f32.partialorder %v1355_v44, 0.0  ;;  %v1370_v58 = vsel %vm570_vm4, %v452_v39, %v602_v45 }
 0x152   : > { %v465_v54 = vadd.f32 %v881_v51, %v1343_v24  ;;  %v529_v55 = vadd.f32 %v897_v52, %v1343_v24  ;;  %v456_v56 = vpop.f32.mrb[5].mxu0  ;;  %v520_v57 = vpop.f32.mrb[5].mxu1  ;;  %v616_v59 = vmul.f32 0.01, %v1355_v44  ;;  %v1396_v25 = vsel %vm586_vm5, %v516_v40, %v618_v50 }
 0x153   : > { %v457_v60 = vadd.f32 %v1343_v24, %v456_v56  ;;  %v521_v61 = vadd.f32 %v1343_v24, %v520_v57  ;;  %v882_v62 = vpop.f32.mrb[6].mxu0  ;;  %v898_v63 = vpop.f32.mrb[6].mxu1  ;;  %v1412_v39 = vsel %vm568_vm6, %v1352_v43, %v600_v53 }
 0x154   : > { %vm573_vm8 = vcmp.ge.f32.partialorder %v465_v54, 0.0  ;;  %v605_v0 = vmul.f32 0.01, %v465_v54  ;;  %vm589_vm9 = vcmp.ge.f32.partialorder %v529_v55, 0.0  ;;  %v621_v1 = vmul.f32 0.01, %v529_v55 }
 0x155   : > { %vm571_vm10 = vcmp.ge.f32.partialorder %v457_v60, 0.0  ;;  %v603_v2 = vmul.f32 0.01, %v457_v60  ;;  %vm587_vm11 = vcmp.ge.f32.partialorder %v521_v61, 0.0  ;;  %v619_v3 = vmul.f32 0.01, %v521_v61 }
 0x156   : > { %v1375_v4 = vsel %vm573_vm8, %v465_v54, %v605_v0  ;;  %v1377_v5 = vsel %vm589_vm9, %v529_v55, %v621_v1  ;;  %v468_v6 = vadd.f32 %v882_v62, %v1343_v24  ;;  %v532_v7 = vadd.f32 %v898_v63, %v1343_v24  ;;  %v459_v8 = vpop.f32.mrb[7].mxu0  ;;  %v523_v9 = vpop.f32.mrb[7].mxu1 }
 0x157   : > { %v665_v10 = vmax.f32 %v1357_v46, %v1375_v4  ;;  %v673_v11 = vmax.f32 %v1359_v47, %v1377_v5  ;;  %v1385_v12 = vsel %vm571_vm10, %v457_v60, %v603_v2  ;;  %v1387_v13 = vsel %vm587_vm11, %v521_v61, %v619_v3 }
 0x158   : > { %v663_v14 = vmax.f32 %v1361_v48, %v1385_v12  ;;  %v671_v15 = vmax.f32 %v1363_v49, %v1387_v13  ;;  %vm574_vm12 = vcmp.ge.f32.partialorder %v468_v6, 0.0  ;;  %v606_v16 = vmul.f32 0.01, %v468_v6 }
 0x159   : > { %v885_v17 = vpop.f32.mrb[8].mxu0  ;;  %v901_v18 = vpop.f32.mrb[8].mxu1  ;;  %vm590_vm13 = vcmp.ge.f32.partialorder %v532_v7, 0.0  ;;  %v622_v19 = vmul.f32 0.01, %v532_v7  ;;  %v460_v20 = vadd.f32 %v1343_v24, %v459_v8  ;;  %v524_v21 = vadd.f32 %v1343_v24, %v523_v9 }
 0x15a   : > { %v472_v22 = vpop.f32.mrb[9].mxu0  ;;  %v536_v23 = vpop.f32.mrb[9].mxu1  ;;  %v1398_v26 = vsel %vm574_vm12, %v468_v6, %v606_v16  ;;  %v481_v27 = vadd.f32 %v885_v17, %v1343_v24  ;;  %v545_v28 = vadd.f32 %v901_v18, %v1343_v24  ;;  %v1417_v40 = vsel %vm584_vm7, %v1355_v44, %v616_v59 }
 0x15b   : > { %v886_v29 = vpop.f32.mrb[10].mxu0  ;;  %v902_v30 = vpop.f32.mrb[10].mxu1  ;;  %v666_v31 = vmax.f32 %v1370_v58, %v1398_v26  ;;  %v1404_v32 = vsel %vm590_vm13, %v532_v7, %v622_v19  ;;  %vm572_vm14 = vcmp.ge.f32.partialorder %v460_v20, 0.0  ;;  %v604_v33 = vmul.f32 0.01, %v460_v20 }
 0x15c   : > { %v475_v34 = vpop.f32.mrb[11].mxu0  ;;  %v539_v35 = vpop.f32.mrb[11].mxu1  ;;  %v674_v36 = vmax.f32 %v1396_v25, %v1404_v32  ;;  %vm588_vm15 = vcmp.ge.f32.partialorder %v524_v21, 0.0  ;;  %v620_v37 = vmul.f32 0.01, %v524_v21  ;;  %v473_v38 = vadd.f32 %v1343_v24, %v472_v22 }
 0x15d   : > { %v1419_v41 = vsel %vm572_vm14, %v460_v20, %v604_v33  ;;  %vm577_vm0 = vcmp.ge.f32.partialorder %v481_v27, 0.0  ;;  %v609_v50 = vmul.f32 0.01, %v481_v27  ;;  %vm593_vm1 = vcmp.ge.f32.partialorder %v545_v28, 0.0 }
 0x15e   : > { %v664_v42 = vmax.f32 %v1412_v39, %v1419_v41  ;;  %v1423_v45 = vsel %vm588_vm15, %v524_v21, %v620_v37  ;;  %v625_v43 = vmul.f32 0.01, %v545_v28  ;;  %v537_v52 = vadd.f32 %v1343_v24, %v536_v23 }
 0x15f   : > { %v672_v51 = vmax.f32 %v1417_v40, %v1423_v45  ;;  %v607_v53 = vmul.f32 0.01, %v473_v38  ;;  %v484_v44 = vadd.f32 %v886_v29, %v1343_v24  ;;  %v548_v54 = vadd.f32 %v902_v30, %v1343_v24 }
 0x160   : > { %v1431_v55 = vadd.f32 %v1343_v24, %v475_v34  ;;  %vm575_vm2 = vcmp.ge.f32.partialorder %v473_v38, 0.0  ;;  %vm591_vm3 = vcmp.ge.f32.partialorder %v537_v52, 0.0  ;;  %v623_v59 = vmul.f32 0.01, %v537_v52 }
 0x161   : > { %v889_v56 = vpop.f32.mrb[12].mxu0  ;;  %v905_v57 = vpop.f32.mrb[12].mxu1  ;;  %vm578_vm4 = vcmp.ge.f32.partialorder %v484_v44, 0.0  ;;  %v610_v63 = vmul.f32 0.01, %v484_v44  ;;  %v1435_v1 = vadd.f32 %v1343_v24, %v539_v35  ;;  %v641_v2 = vsel %vm577_vm0, %v481_v27, %v609_v50 }
 0x162   : > { %v497_v60 = vadd.f32 %v889_v56, %v1343_v24  ;;  %v488_v61 = vpop.f32.mrb[13].mxu0  ;;  %v552_v62 = vpop.f32.mrb[13].mxu1  ;;  %v626_v0 = vmul.f32 0.01, %v548_v54  ;;  %v657_v3 = vsel %vm593_vm1, %v545_v28, %v625_v43  ;;  %vm594_vm5 = vcmp.ge.f32.partialorder %v548_v54, 0.0 }
 0x163   : > { %v890_v6 = vpop.f32.mrb[14].mxu0  ;;  %v906_v7 = vpop.f32.mrb[14].mxu1  ;;  %v639_v8 = vsel %vm575_vm2, %v473_v38, %v607_v53  ;;  %v655_v9 = vsel %vm591_vm3, %v537_v52, %v623_v59  ;;  %v608_v16 = vmul.f32 0.01, %v1431_v55  ;;  %v642_v19 = vsel %vm578_vm4, %v484_v44, %v610_v63 }
 0x164   : > { %vm581_vm6 = vcmp.ge.f32.partialorder %v497_v60, 0.0  ;;  %v491_v17 = vpop.f32.mrb[15].mxu0  ;;  %v555_v18 = vpop.f32.mrb[15].mxu1  ;;  %v613_v20 = vmul.f32 0.01, %v497_v60  ;;  %v561_v21 = vadd.f32 %v905_v57, %v1343_v24  ;;  %v489_v22 = vadd.f32 %v1343_v24, %v488_v61 }
 0x165   : > { %v658_v23 = vsel %vm594_vm5, %v548_v54, %v626_v0  ;;  %vm576_vm7 = vcmp.ge.f32.partialorder %v1431_v55, 0.0  ;;  %vm592_vm8 = vcmp.ge.f32.partialorder %v1435_v1, 0.0  ;;  %v553_v27 = vadd.f32 %v1343_v24, %v552_v62 }
 0x166   : > { %v500_v28 = vadd.f32 %v890_v6, %v1343_v24  ;;  %v564_v29 = vadd.f32 %v906_v7, %v1343_v24  ;;  %v645_v30 = vsel %vm581_vm6, %v497_v60, %v613_v20  ;;  %vm597_vm9 = vcmp.ge.f32.partialorder %v561_v21, 0.0 }
 0x167   : > { %v629_v33 = vmul.f32 0.01, %v561_v21  ;;  %vm579_vm10 = vcmp.ge.f32.partialorder %v489_v22, 0.0  ;;  %v669_v34 = vmax.f32 %v641_v2, %v645_v30  ;;  %v611_v35 = vmul.f32 0.01, %v489_v22 }
 0x168   : > { %vm595_vm11 = vcmp.ge.f32.partialorder %v553_v27, 0.0  ;;  %v627_v37 = vmul.f32 0.01, %v553_v27  ;;  %vm582_vm12 = vcmp.ge.f32.partialorder %v500_v28, 0.0  ;;  %v614_v50 = vmul.f32 0.01, %v500_v28 }
 0x169   : > { %v661_v38 = vsel %vm597_vm9, %v561_v21, %v629_v33  ;;  %vm598_vm13 = vcmp.ge.f32.partialorder %v564_v29, 0.0  ;;  %v681_v43 = vmax.f32 %v665_v10, %v669_v34  ;;  %v643_v53 = vsel %vm579_vm10, %v489_v22, %v611_v35 }
 0x16a   : > { %v677_v52 = vmax.f32 %v657_v3, %v661_v38  ;;  %v659_v44 = vsel %vm595_vm11, %v553_v27, %v627_v37  ;;  %v667_v54 = vmax.f32 %v639_v8, %v643_v53  ;;  %v646_v57 = vsel %vm582_vm12, %v500_v28, %v614_v50 }
 0x16b   : > { %v675_v56 = vmax.f32 %v655_v9, %v659_v44  ;;  %v630_v59 = vmul.f32 0.01, %v564_v29  ;;  %v670_v61 = vmax.f32 %v642_v19, %v646_v57  ;;  %v492_v62 = vadd.f32 %v1343_v24, %v491_v17 }
 0x16c   : > { %v685_v60 = vmax.f32 %v673_v11, %v677_v52  ;;  %v556_v63 = vadd.f32 %v1343_v24, %v555_v18  ;;  %v624_v46 = vmul.f32 0.01, %v1435_v1  ;;  %v679_v4 = vmax.f32 %v663_v14, %v667_v54 }
 0x16d   : > { %v683_v10 = vmax.f32 %v671_v15, %v675_v56  ;;  %v662_v0 = vsel %vm598_vm13, %v564_v29, %v630_v59  ;;  %v682_v47 = vmax.f32 %v666_v31, %v670_v61  ;;  %vm580_vm14 = vcmp.ge.f32.partialorder %v492_v62, 0.0 }
 0x16e   : > { %v689_v2 = vmax.f32 %v681_v43, %v685_v60  ;;  %v678_v5 = vmax.f32 %v658_v23, %v662_v0  ;;  %v612_v11 = vmul.f32 0.01, %v492_v62  ;;  %vm596_vm15 = vcmp.ge.f32.partialorder %v556_v63, 0.0 }
 0x16f   : > { %v687_v24 = vmax.f32 %v679_v4, %v683_v10  ;;  %v628_v3 = vmul.f32 0.01, %v556_v63  ;;  %v640_v49 = vsel %vm576_vm7, %v1431_v55, %v608_v16  ;;  %v656_v58 = vsel %vm592_vm8, %v1435_v1, %v624_v46 }
 0x170   : > { %693 = vst [vmem:[%s203_s9 + $0x10] sm:$0xff] %v689_v2  ;;  %v686_v48 = vmax.f32 %v674_v36, %v678_v5  ;;  %v644_v12 = vsel %vm580_vm14, %v492_v62, %v612_v11 }
 0x171   : > { %691 = vst [vmem:[%s203_s9] sm:$0xff] %v687_v24  ;;  %v660_v13 = vsel %vm596_vm15, %v556_v63, %v628_v3  ;;  %v668_v15 = vmax.f32 %v640_v49, %v644_v12 }
 0x172   : > { %v690_v14 = vmax.f32 %v682_v47, %v686_v48  ;;  %v676_v26 = vmax.f32 %v656_v58, %v660_v13 }
 0x173   : > { %v680_v25 = vmax.f32 %v664_v42, %v668_v15 }
 0x174   : > { %694 = vst [vmem:[%s203_s9 + $0x18] sm:$0xff] %v690_v14  ;;  %v684_v31 = vmax.f32 %v672_v51, %v676_v26 }
 0x176   : > { %v688_v32 = vmax.f32 %v680_v25, %v684_v31 }
 0x178   : > { %692 = vst [vmem:[%s203_s9 + $0x8] sm:$0xff] %v688_v32 }
 0x179   : > { %1079 = shalt.err (!%p1076_p7)
}
 0x17a   : > { %s1080_s22 = scalar_lea.hbm %s1486_s27, 512  ;;  %s1084_s11 = scalar_lea.hbm %s1535_s3, 1024 }
 0x17b   : > { %p1081_p9 = scmp.ne.s32.totalorder %s1486_s27, %s1080_s22  ;;  %p1085_p5 = scmp.lt.u32.totalorder %s1486_s27, %s1535_s3 }
 0x17c   : > { %p1086_p11 = scmp.lt.u32.totalorder %s1084_s11, %s1080_s22  ;;  %p1088_p4 = scmp.lt.u32.totalorder %s1080_s22, %s1486_s27 }
 0x17d   : > { %p1082_p1 = pnand %p1081_p9, %p1259_p12 }
 0x17e   : > { %p1087_p2 = por %p1086_p11, %p1085_p5 }
 0x17f   : > { %p1083_p0 = pneg %p1082_p1 }
 0x180   : > { %p1089_p6 = por %p1088_p4, %p1087_p2 }
 0x182   : > { %p1090_p8 = pnand %p1089_p6, %p1083_p0 }
 0x184   : > { %1093 = shalt.err (!%p1090_p8)
}
 0x185   : > { %s1143_s8 = smov 128   ;;  %s1144_s9 = smov 8  }
 0x186   : > { %929 = dma.vmem_to_hbm [thread:$0]  (%p1259_p12), %s1488_s25, 512, %s1486_s27, %s696_s16, %s1143_s8, %s1143_s8, %s1144_s9  }
 0x187 PF: > { %s724_s4 = sand.u32 1, %s1124_s12   ;;  %p1550_p10 = scmp.ne.s32.totalorder %s1540_s19, 0 }
 0x188   : > { %p1551_p13 = scmp.ge.s32.totalorder %s1136_s15, 2  ;;  %s725_s26 = scalar_lea.sflag [#allocation4], %s724_s4 }
 0x18a   : > { %p940_p3 = pnand %p1551_p13, %p1550_p10 }
 0x18c   : > { %1119 = dma.done.wait (!%p940_p3), %s725_s26, 512  }
 0x18d   : > { %1121 = vsyncadd (!%p940_p3), %s725_s26, 4294966784  ;;  %p17_p7 = scmp.ge.s32.totalorder %s1221_s24, 4   ;;  %s1552_s12 = smov %s1128_s13 }
 0x18e   : > { %s1553_s13 = smov %s1132_s14  ;;  %s1554_s14 = smov %s1255_s17 }
 0x18f   : > { %s1555_s15 = smov %s1221_s24  ;;  %19 = sbr.rel (!%p17_p7) target bundleno = 6 (0x6), region = 81 }
 0x196   :  { %730 = vsyncpa [#allocation3], 1 }
 0x197   :  { %732 = vsyncpa [#allocation3 + $0x1], 1 }
 0x198   :  { %733 = vsyncpa [#allocation6], 1 }
 0x199   :  { %734 = vsyncpa [#allocation4], 1 }
 0x19a   :  { %736 = vsyncpa [#allocation4 + $0x1], 1 }

</bundles_post_ra>
